<compile_context>
chip_gen: v7x
topology: tpu7x:2x2x1
jax: 0.10.0
libtpu: 0.0.40
codegen_flags: <defaults>
</compile_context>

<pallas_src>
from functools import partial

import numpy as np
import jax
import jax.numpy as jnp
from jax.experimental import pallas as pl
from jax.experimental.pallas import tpu as pltpu


# ----------------------------- constant (trace-time) operators -----------------------------

def _gaussian_1d(kernel_size: int, sigma: float) -> np.ndarray:
    center = kernel_size // 2
    g = np.exp(-((np.arange(kernel_size) - center) ** 2) / (2.0 * sigma ** 2))
    g /= g.sum()
    return g  # float64; product of 3 normalized 1-D kernels == normalized 3-D kernel exactly


def _reflect_band(length: int, kernel_size: int, sigma: float) -> np.ndarray:
    """(length, length) matrix M such that (M @ x) is the 1-D gaussian correlation of x with
    PyTorch-style 'reflect' padding folded into the boundary rows."""
    K = kernel_size
    p = (K - 1) // 2
    g = _gaussian_1d(K, sigma)
    M = np.zeros((length, length), dtype=np.float64)
    for o in range(length):
        for t in range(K):
            s = o - p + t
            if s < 0:                    # reflect (edge not repeated), single reflection
                s = -s
            elif s >= length:
                s = 2 * (length - 1) - s
            M[o, s] += g[t]
    return M


def _gaussian_kernel3d(kernel_size: int, sigma: float) -> np.ndarray:
    """Same construction as the PyTorch module __init__ (for the reference check)."""
    c = kernel_size // 2
    k = np.zeros((kernel_size,) * 3, dtype=np.float64)
    for i in range(kernel_size):
        for j in range(kernel_size):
            for kk in range(kernel_size):
                k[i, j, kk] = np.exp(
                    -((i - c) ** 2 + (j - c) ** 2 + (kk - c) ** 2) / (2.0 * sigma ** 2)
                )
    k /= k.sum()
    return k.astype(np.float32)


# ------------------------------ generation-dependent tiling --------------------------------

def _tensorcores_per_chip() -> int:
    """Best-effort TensorCore-per-device count.  v7x exposes 2 TCs that
    dimension_semantics=('parallel',) can shard across; v5e/v6e expose 1."""
    try:
        kind = jax.devices()[0].device_kind.lower()
    except Exception:
        return 1
    return 2 if "v7" in kind else 1


def _pick_channel_block(C: int, D: int, n_cores: int) -> int:
    """Largest channel block Cb (divisor of C) that still leaves >= n_cores grid steps and
    keeps the (Cb*D) sublane dim 8-aligned (or covers the full array)."""
    target = max(1, C // max(1, n_cores))
    for cb in range(target, 0, -1):
        if C % cb != 0:
            continue
        if cb == C or (cb * D) % 8 == 0:
            return cb
    return C


# ------------------------------------- Pallas kernel ---------------------------------------

def _blur_kernel(x_ref, bdl_ref, bhw_t_ref, o_ref):
    # x_ref:     (Cb*D, HWp)    slab of Cb channels; lane dim = padded H*W (dense, 128-aligned)
    # bdl_ref:   (Cb*D, Cb*D)   block-diagonal kron(I_Cb, A_D): depth-axis reflect-conv band
    # bhw_t_ref: (HWp, HWp)     kron(A_H, A_W)^T: fused H+W reflect-conv
    # o_ref:     (Cb*D, HWp)
    y = jnp.dot(bdl_ref[...], x_ref[...], preferred_element_type=jnp.float32)    # D pass  (MXU)
    z = jnp.dot(y, bhw_t_ref[...], preferred_element_type=jnp.float32)           # H+W pass(MXU)
    o_ref[...] = z.astype(o_ref.dtype)


@partial(jax.jit, static_argnums=(1, 2))
def gaussian_blur3d(x: jax.Array, kernel_size: int, sigma: float) -> jax.Array:
    """x: (C, D, H, W) float32 -> (C, D, H, W), per-channel (depthwise) gaussian blur."""
    C, D, H, W = x.shape
    K = kernel_size
    assert K % 2 == 1, "kernel_size must be odd (matches the PyTorch module's padding math)"
    p = (K - 1) // 2
    assert p < D and p < H and p < W, "reflect padding requires padding < spatial dim"

    # --- tiling choice (generation dependent) ------------------------------------------------
    n_cores = _tensorcores_per_chip()
    Cb = _pick_channel_block(C, D, n_cores)      # channels per grid step
    n_steps = C // Cb
    MB = Cb * D                                  # matmul M dim per step

    HW = H * W
    HWp = -(-HW // 128) * 128                    # lane-dense guard: pad HW to multiple of 128

    # --- constant band operators (reflect padding folded in, built at trace time) ------------
    a_d = _reflect_band(D, K, sigma)
    a_h = _reflect_band(H, K, sigma)
    a_w = _reflect_band(W, K, sigma)

    kron_hw_t = np.zeros((HWp, HWp), dtype=np.float64)
    kron_hw_t[:HW, :HW] = np.kron(a_h, a_w).T                     # (HW, HW) fused H+W operator
    bhw_t = jnp.asarray(kron_hw_t.astype(np.float32))             # (HWp, HWp)
    bdl = jnp.asarray(np.kron(np.eye(Cb), a_d).astype(np.float32))  # (Cb*D, Cb*D) block-diag

    # --- lane-dense input slab ----------------------------------------------------------------
    x2 = x.reshape(C * D, HW)                    # contiguous reshape: free
    if HWp != HW:
        x2 = jnp.pad(x2, ((0, 0), (0, HWp - HW)))

    # --- scheduling hints / VMEM budget ---------------------------------------------------------
    flops = 2 * n_steps * (MB * MB * HWp + MB * HWp * HWp)
    bytes_accessed = 4 * (2 * C * D * HWp + MB * MB + HWp * HWp)
    # x/out blocks double-buffered, constants single-buffered.
    vmem_est = 4 * (2 * 2 * MB * HWp + MB * MB + HWp * HWp)
    cp_kwargs = dict(dimension_semantics=("parallel",))
    if vmem_est > 30 * 1024 * 1024:              # only override the default scoped limit if needed
        cp_kwargs["vmem_limit_bytes"] = min(int(vmem_est * 5 // 4), 64 * 1024 * 1024)

    out2 = pl.pallas_call(
        _blur_kernel,
        out_shape=jax.ShapeDtypeStruct((C * D, HWp), x.dtype),
        grid_spec=pltpu.PrefetchScalarGridSpec(
            num_scalar_prefetch=0,
            grid=(n_steps,),
            in_specs=[
                pl.BlockSpec((MB, HWp), lambda c: (c, 0)),
                # constant operands: same block every step -> single-buffer them
                pl.BlockSpec((MB, MB), lambda c: (0, 0), pipeline_mode=pl.Buffered(1)),
                pl.BlockSpec((HWp, HWp), lambda c: (0, 0), pipeline_mode=pl.Buffered(1)),
            ],
            out_specs=pl.BlockSpec((MB, HWp), lambda c: (c, 0)),
        ),
        compiler_params=pltpu.CompilerParams(**cp_kwargs),
        cost_estimate=pl.CostEstimate(
            flops=flops, transcendentals=0, bytes_accessed=bytes_accessed
        ),
    )(x2, bdl, bhw_t)

    if HWp != HW:
        out2 = out2[:, :HW]
    return out2.reshape(C, D, H, W)


# ----------------------------------- pure-JAX reference ------------------------------------

def gaussian_blur3d_reference(x: jax.Array, kernel_size: int, sigma: float) -> jax.Array:
    """Same math as the PyTorch forward: reflect pad + depthwise conv3d with the 3-D kernel."""
    C, D, H, W = x.shape
    K = kernel_size
    p = (K - 1) // 2
    kern = jnp.asarray(_gaussian_kernel3d(K, sigma))
    x_pad = jnp.pad(x, ((0, 0), (p, p), (p, p), (p, p)), mode="reflect")
    w = jnp.broadcast_to(kern[None, None], (C, 1, K, K, K))
    out = jax.lax.conv_general_dilated(
        x_pad[None],
        w,
        window_strides=(1, 1, 1),
        padding="VALID",
        dimension_numbers=("NCDHW", "OIDHW", "NCDHW"),
        feature_group_count=C,
        precision=jax.lax.Precision.HIGHEST,
    )
    return out[0]


if __name__ == "__main__":
    channels = 2
    dim = 16
    kernel_size = 5
    sigma = 1.5

    key = jax.random.PRNGKey(0)
    x = jax.random.normal(key, (channels, dim, dim, dim), dtype=jnp.float32)

    y = jax.block_until_ready(gaussian_blur3d(x, kernel_size, sigma))
    y_ref = jax.block_until_ready(gaussian_blur3d_reference(x, kernel_size, sigma))

    assert y.shape == (channels, dim, dim, dim)
    np.testing.assert_allclose(np.asarray(y), np.asarray(y_ref), rtol=1e-4, atol=1e-4)

    print("KERNEL_OK")
</pallas_src>

<mosaic_0001>
module attributes {stable_mosaic.version = 11 : i64} {
  func.func @_blur_kernel(%arg0: i32, %arg1: memref<32x256xf32, #tpu.memory_space<vmem>>, %arg2: memref<32x32xf32, #tpu.memory_space<vmem>>, %arg3: memref<256x256xf32, #tpu.memory_space<vmem>>, %arg4: memref<32x256xf32, #tpu.memory_space<vmem>>) attributes {dimension_semantics = [#tpu.dimension_semantics<parallel>], iteration_bounds = array<i64: 1>, scalar_prefetch = 0 : i64, scratch_operands = 0 : i64, tpu.core_type = #tpu.core_type<tc>, window_params = [{transform_indices = @transform_0, window_bounds = array<i64: 32, 256>}, {pipeline_mode = #tpu.pipeline_mode<synchronous>, transform_indices = @transform_1, window_bounds = array<i64: 32, 32>}, {pipeline_mode = #tpu.pipeline_mode<synchronous>, transform_indices = @transform_2, window_bounds = array<i64: 256, 256>}, {transform_indices = @transform_3, window_bounds = array<i64: 32, 256>}]} {
    %c0 = arith.constant 0 : index
    %c0_0 = arith.constant 0 : index
    %0 = vector.load %arg2[%c0, %c0_0] : memref<32x32xf32, #tpu.memory_space<vmem>>, vector<32x32xf32>
    %c0_1 = arith.constant 0 : index
    %c0_2 = arith.constant 0 : index
    %1 = vector.load %arg1[%c0_1, %c0_2] : memref<32x256xf32, #tpu.memory_space<vmem>>, vector<32x256xf32>
    %cst = arith.constant dense<0.000000e+00> : vector<32x256xf32>
    %2 = tpu.matmul %0, %1, %cst {dimension_numbers = #tpu.dot_dimension_numbers<[1], [0], [0], [1], [0, 0, 1, 1], [], []>} : vector<32x32xf32>, vector<32x256xf32>, vector<32x256xf32> -> vector<32x256xf32>
    %c0_3 = arith.constant 0 : index
    %c0_4 = arith.constant 0 : index
    %3 = vector.load %arg3[%c0_3, %c0_4] : memref<256x256xf32, #tpu.memory_space<vmem>>, vector<256x256xf32>
    %cst_5 = arith.constant dense<0.000000e+00> : vector<32x256xf32>
    %4 = tpu.matmul %2, %3, %cst_5 {dimension_numbers = #tpu.dot_dimension_numbers<[1], [0], [0], [1], [0, 0, 1, 1], [], []>} : vector<32x256xf32>, vector<256x256xf32>, vector<32x256xf32> -> vector<32x256xf32>
    %c0_6 = arith.constant 0 : index
    %c0_7 = arith.constant 0 : index
    %5 = vector.load %arg4[%c0_6, %c0_7] : memref<32x256xf32, #tpu.memory_space<vmem>>, vector<32x256xf32>
    tpu.vector_store %arg4[%c0_6, %c0_7], %4 {strides = array<i32>} : memref<32x256xf32, #tpu.memory_space<vmem>>, vector<32x256xf32>,
    return
  }
  func.func @transform_0(%arg0: i32) -> (i32, i32) {
    %c0_i32 = arith.constant 0 : i32
    %c0_i32_0 = arith.constant 0 : i32
    return %arg0, %c0_i32 : i32, i32
  }
  func.func @transform_1(%arg0: i32) -> (i32, i32) {
    %c0_i32 = arith.constant 0 : i32
    %c0_i32_0 = arith.constant 0 : i32
    %c0_i32_1 = arith.constant 0 : i32
    return %c0_i32, %c0_i32_0 : i32, i32
  }
  func.func @transform_2(%arg0: i32) -> (i32, i32) {
    %c0_i32 = arith.constant 0 : i32
    %c0_i32_0 = arith.constant 0 : i32
    %c0_i32_1 = arith.constant 0 : i32
    return %c0_i32, %c0_i32_0 : i32, i32
  }
  func.func @transform_3(%arg0: i32) -> (i32, i32) {
    %c0_i32 = arith.constant 0 : i32
    %c0_i32_0 = arith.constant 0 : i32
    return %arg0, %c0_i32 : i32, i32
  }
}

</mosaic_0001>

<bundles_post_ra>
// kernel: gaussian_blur3d.1
= control target key start
LH: loop header
LB: loop body
LE: loop exit
PB: predicated region body
PF: predicated region fallthrough
CT: control target
= control target key end

     0   :  { %v402_v3 = vmov 0.0   ;;  %vm26_vm0 = vcmask 261120   ;;  %s683_s0 = inlined_call_operand.vmem [shape: f32[32,256], index: 0, kind: input, shape index: {}]   ;;  %s684_s2 = inlined_call_operand.vmem [shape: f32[256,256], index: 2, kind: input, shape index: {}]   ;;  %s685_s1 = inlined_call_operand.vmem [shape: f32[32,32], index: 1, kind: input, shape index: {}]   ;;  %s686_s3 = inlined_call_operand.vmem [shape: f32[32,256], index: 3, kind: output, shape index: {}]  }
   0x1   :  { %v19_v0 = vld [vmem:[%s683_s0 + $0x8] sm:$0xff]  ;;  %v21_v1 = vld [vmem:[%s683_s0 + $0x18] sm:$0xff]  ;;  %v18_v2 = vld [vmem:[%s683_s0] sm:$0xff]  ;;  %103 = vmatprep.mubr.f32.mxu0 %v402_v3 }
   0x2   :  { %v297_v4 = vpack.c.bf16 %v21_v1, %v19_v0  ;;  %v20_v5 = vld [vmem:[%s683_s0 + $0x10] sm:$0xff]  ;;  %v23_v6 = vld [vmem:[%s683_s0 + $0x28] sm:$0xff]  ;;  %v25_v7 = vld [vmem:[%s683_s0 + $0x38] sm:$0xff] }
   0x3   :  { %v299_v8 = vpack.c.bf16 %v20_v5, %v18_v2  ;;  %v301_v9 = vpack.c.bf16 %v25_v7, %v23_v6  ;;  %v22_v10 = vld [vmem:[%s683_s0 + $0x20] sm:$0xff]  ;;  %v24_v11 = vld [vmem:[%s683_s0 + $0x30] sm:$0xff]  ;;  %v129_v13 = vld [vmem:[%s684_s2 + $0x8] sm:$0xff] }
   0x4   :  { %298 = vmatprep.subr.bf16.mxu0 %v297_v4  ;;  %v303_v12 = vpack.c.bf16 %v24_v11, %v22_v10  ;;  %v131_v14 = vld [vmem:[%s684_s2 + $0x18] sm:$0xff]  ;;  %v128_v15 = vld [vmem:[%s684_s2] sm:$0xff]  ;;  %v130_v17 = vld [vmem:[%s684_s2 + $0x10] sm:$0xff] }
   0x5   :  { %300 = vmatpush1.bf16.msra.mxu0 %v299_v8  ;;  %v305_v16 = vpack.c.bf16 %v131_v14, %v129_v13  ;;  %v133_v18 = vld [vmem:[%s684_s2 + $0x28] sm:$0xff]  ;;  %v135_v19 = vld [vmem:[%s684_s2 + $0x38] sm:$0xff]  ;;  %v307_v20 = vpack.c.bf16 %v130_v17, %v128_v15  ;;  %v14_v22 = vld [vmem:[%s685_s1] sm:$0xff] }
   0x6   :  { %302 = vmatprep.subr.bf16.mxu0 %v301_v9  ;;  %v309_v21 = vpack.c.bf16 %v135_v19, %v133_v18  ;;  %v132_v23 = vld [vmem:[%s684_s2 + $0x20] sm:$0xff]  ;;  %v134_v24 = vld [vmem:[%s684_s2 + $0x30] sm:$0xff]  ;;  %v137_v25 = vld [vmem:[%s684_s2 + $0x48] sm:$0xff] }
   0x7   :  { %369 = vmatprep.subr.bf16.mxu1 %v305_v16  ;;  %v139_v26 = vld [vmem:[%s684_s2 + $0x58] sm:$0xff]  ;;  %v311_v27 = vpack.c.bf16 %v134_v24, %v132_v23  ;;  %v15_v28 = vld [vmem:[%s685_s1 + $0x8] sm:$0xff]  ;;  %v136_v30 = vld [vmem:[%s684_s2 + $0x40] sm:$0xff] }
   0x8   :  { %385 = vmatpush1.bf16.msra.mxu1 %v307_v20  ;;  %v313_v29 = vpack.c.bf16 %v139_v26, %v137_v25  ;;  %v138_v31 = vld [vmem:[%s684_s2 + $0x50] sm:$0xff]  ;;  %v141_v32 = vld [vmem:[%s684_s2 + $0x68] sm:$0xff]  ;;  %v143_v33 = vld [vmem:[%s684_s2 + $0x78] sm:$0xff] }
   0x9   :  { %304 = vmatpush1.bf16.msra.mxu0 %v303_v12  ;;  %370 = vmatprep.subr.bf16.mxu1 %v309_v21  ;;  %v315_v34 = vpack.c.bf16 %v138_v31, %v136_v30  ;;  %v16_v35 = vld [vmem:[%s685_s1 + $0x10] sm:$0xff]  ;;  %v317_v36 = vpack.c.bf16 %v143_v33, %v141_v32  ;;  %v140_v37 = vld [vmem:[%s684_s2 + $0x60] sm:$0xff]  ;;  %v145_v39 = vld [vmem:[%s684_s2 + $0x88] sm:$0xff] }
   0xa   :  { %306 = vmatprep.subr.bf16.mxu0 %v305_v16  ;;  %v142_v38 = vld [vmem:[%s684_s2 + $0x70] sm:$0xff]  ;;  %v147_v40 = vld [vmem:[%s684_s2 + $0x98] sm:$0xff]  ;;  %v144_v44 = vld [vmem:[%s684_s2 + $0x80] sm:$0xff] }
   0xb   :  { %v319_v41 = vpack.c.bf16 %v142_v38, %v140_v37  ;;  %v17_v42 = vld [vmem:[%s685_s1 + $0x18] sm:$0xff]  ;;  %v321_v43 = vpack.c.bf16 %v147_v40, %v145_v39  ;;  %v146_v45 = vld [vmem:[%s684_s2 + $0x90] sm:$0xff]  ;;  %v149_v46 = vld [vmem:[%s684_s2 + $0xa8] sm:$0xff] }
   0xc   :  { %293 = vmatmul.mubr.msk.f32.vlgmr.msra.gmra.mrb[0].mxu0 %vm26_vm0, %v14_v22  ;;  %386 = vmatpush1.bf16.msra.mxu1 %v311_v27  ;;  %v151_v47 = vld [vmem:[%s684_s2 + $0xb8] sm:$0xff]  ;;  %v323_v48 = vpack.c.bf16 %v146_v45, %v144_v44  ;;  %v148_v50 = vld [vmem:[%s684_s2 + $0xa0] sm:$0xff]  ;;  %v150_v51 = vld [vmem:[%s684_s2 + $0xb0] sm:$0xff] }
   0xd   :  { %109 = vmatprep.mubr.f32.mxu0 %v402_v3  ;;  %308 = vmatpush1.bf16.msra.mxu0 %v307_v20  ;;  %v325_v49 = vpack.c.bf16 %v151_v47, %v149_v46  ;;  %v153_v52 = vld [vmem:[%s684_s2 + $0xc8] sm:$0xff]  ;;  %v155_v53 = vld [vmem:[%s684_s2 + $0xd8] sm:$0xff]  ;;  %v327_v54 = vpack.c.bf16 %v150_v51, %v148_v50  ;;  %v152_v56 = vld [vmem:[%s684_s2 + $0xc0] sm:$0xff] }
   0xe   :  { %310 = vmatprep.subr.bf16.mxu0 %v309_v21  ;;  %371 = vmatprep.subr.bf16.mxu1 %v313_v29  ;;  %v329_v55 = vpack.c.bf16 %v155_v53, %v153_v52  ;;  %v154_v57 = vld [vmem:[%s684_s2 + $0xd0] sm:$0xff]  ;;  %v157_v58 = vld [vmem:[%s684_s2 + $0xe8] sm:$0xff]  ;;  %v159_v59 = vld [vmem:[%s684_s2 + $0xf8] sm:$0xff] }
   0xf   :  { %v331_v60 = vpack.c.bf16 %v154_v57, %v152_v56  ;;  %v333_v61 = vpack.c.bf16 %v159_v59, %v157_v58  ;;  %v156_v62 = vld [vmem:[%s684_s2 + $0xe0] sm:$0xff]  ;;  %v158_v63 = vld [vmem:[%s684_s2 + $0xf0] sm:$0xff]  ;;  %v161_v0 = vld [vmem:[%s684_s2 + $0x108] sm:$0xff] }
  0x10   :  { %294 = vmatmul.mubr.msk.f32.gmra.mrb[2].mxu0 %vm26_vm0, %v15_v28  ;;  %387 = vmatpush1.bf16.msra.mxu1 %v315_v34  ;;  %v163_v1 = vld [vmem:[%s684_s2 + $0x118] sm:$0xff]  ;;  %v335_v2 = vpack.c.bf16 %v158_v63, %v156_v62  ;;  %v160_v4 = vld [vmem:[%s684_s2 + $0x100] sm:$0xff]  ;;  %v162_v5 = vld [vmem:[%s684_s2 + $0x110] sm:$0xff] }
  0x11   :  { %115 = vmatprep.mubr.f32.mxu0 %v402_v3  ;;  %312 = vmatpush1.bf16.msra.mxu0 %v311_v27  ;;  %v165_v6 = vld [vmem:[%s684_s2 + $0x128] sm:$0xff]  ;;  %v167_v7 = vld [vmem:[%s684_s2 + $0x138] sm:$0xff]  ;;  %v339_v8 = vpack.c.bf16 %v162_v5, %v160_v4  ;;  %v164_v10 = vld [vmem:[%s684_s2 + $0x120] sm:$0xff] }
  0x12   :  { %314 = vmatprep.subr.bf16.mxu0 %v313_v29  ;;  %372 = vmatprep.subr.bf16.mxu1 %v317_v36  ;;  %v341_v9 = vpack.c.bf16 %v167_v7, %v165_v6  ;;  %v166_v11 = vld [vmem:[%s684_s2 + $0x130] sm:$0xff]  ;;  %v169_v12 = vld [vmem:[%s684_s2 + $0x148] sm:$0xff]  ;;  %v171_v13 = vld [vmem:[%s684_s2 + $0x158] sm:$0xff] }
  0x13   :  { %v343_v14 = vpack.c.bf16 %v166_v11, %v164_v10  ;;  %v345_v15 = vpack.c.bf16 %v171_v13, %v169_v12  ;;  %v168_v16 = vld [vmem:[%s684_s2 + $0x140] sm:$0xff]  ;;  %v170_v17 = vld [vmem:[%s684_s2 + $0x150] sm:$0xff]  ;;  %v173_v18 = vld [vmem:[%s684_s2 + $0x168] sm:$0xff] }
  0x14   :  { %295 = vmatmul.mubr.msk.f32.gmra.mrb[4].mxu0 %vm26_vm0, %v16_v35  ;;  %388 = vmatpush1.bf16.msra.mxu1 %v319_v41  ;;  %v175_v19 = vld [vmem:[%s684_s2 + $0x178] sm:$0xff]  ;;  %v347_v20 = vpack.c.bf16 %v170_v17, %v168_v16  ;;  %v172_v22 = vld [vmem:[%s684_s2 + $0x160] sm:$0xff]  ;;  %v174_v23 = vld [vmem:[%s684_s2 + $0x170] sm:$0xff] }
  0x15   :  { %121 = vmatprep.mubr.f32.mxu0 %v402_v3  ;;  %316 = vmatpush1.bf16.msra.mxu0 %v315_v34  ;;  %v337_v3 = vpack.c.bf16 %v163_v1, %v161_v0  ;;  %v349_v21 = vpack.c.bf16 %v175_v19, %v173_v18  ;;  %v177_v24 = vld [vmem:[%s684_s2 + $0x188] sm:$0xff]  ;;  %v179_v25 = vld [vmem:[%s684_s2 + $0x198] sm:$0xff]  ;;  %v351_v26 = vpack.c.bf16 %v174_v23, %v172_v22  ;;  %v176_v28 = vld [vmem:[%s684_s2 + $0x180] sm:$0xff] }
  0x16   :  { %318 = vmatprep.subr.bf16.mxu0 %v317_v36  ;;  %373 = vmatprep.subr.bf16.mxu1 %v321_v43  ;;  %v353_v27 = vpack.c.bf16 %v179_v25, %v177_v24  ;;  %v178_v29 = vld [vmem:[%s684_s2 + $0x190] sm:$0xff]  ;;  %v181_v30 = vld [vmem:[%s684_s2 + $0x1a8] sm:$0xff]  ;;  %v183_v31 = vld [vmem:[%s684_s2 + $0x1b8] sm:$0xff] }
  0x17   :  { %v355_v32 = vpack.c.bf16 %v178_v29, %v176_v28  ;;  %v357_v33 = vpack.c.bf16 %v183_v31, %v181_v30  ;;  %v180_v34 = vld [vmem:[%s684_s2 + $0x1a0] sm:$0xff]  ;;  %v182_v35 = vld [vmem:[%s684_s2 + $0x1b0] sm:$0xff]  ;;  %v185_v36 = vld [vmem:[%s684_s2 + $0x1c8] sm:$0xff] }
  0x18   :  { %296 = vmatmul.mubr.msk.f32.gmra.mrb[6].mxu0 %vm26_vm0, %v17_v42  ;;  %389 = vmatpush1.bf16.msra.mxu1 %v323_v48  ;;  %v187_v37 = vld [vmem:[%s684_s2 + $0x1d8] sm:$0xff]  ;;  %v359_v38 = vpack.c.bf16 %v182_v35, %v180_v34  ;;  %v184_v40 = vld [vmem:[%s684_s2 + $0x1c0] sm:$0xff]  ;;  %v189_v42 = vld [vmem:[%s684_s2 + $0x1e8] sm:$0xff] }
  0x19   :  { %320 = vmatpush1.bf16.msra.mxu0 %v319_v41  ;;  %374 = vmatprep.subr.bf16.mxu1 %v325_v49  ;;  %v361_v39 = vpack.c.bf16 %v187_v37, %v185_v36  ;;  %v186_v41 = vld [vmem:[%s684_s2 + $0x1d0] sm:$0xff]  ;;  %v188_v46 = vld [vmem:[%s684_s2 + $0x1e0] sm:$0xff] }
  0x1a   :  { %322 = vmatprep.subr.bf16.mxu0 %v321_v43  ;;  %v191_v43 = vld [vmem:[%s684_s2 + $0x1f8] sm:$0xff]  ;;  %v363_v44 = vpack.c.bf16 %v186_v41, %v184_v40  ;;  %v190_v47 = vld [vmem:[%s684_s2 + $0x1f0] sm:$0xff] }
  0x1b   :  { %v365_v45 = vpack.c.bf16 %v191_v43, %v189_v42 }
  0x1c   :  { %390 = vmatpush1.bf16.msra.mxu1 %v327_v54 }
  0x1d   :  { %324 = vmatpush1.bf16.msra.mxu0 %v323_v48  ;;  %375 = vmatprep.subr.bf16.mxu1 %v329_v55  ;;  %v367_v48 = vpack.c.bf16 %v190_v47, %v188_v46 }
  0x1e   :  { %326 = vmatprep.subr.bf16.mxu0 %v325_v49 }
  0x20   :  { %391 = vmatpush1.bf16.msra.mxu1 %v331_v60 }
  0x21   :  { %328 = vmatpush1.bf16.msra.mxu0 %v327_v54  ;;  %376 = vmatprep.subr.bf16.mxu1 %v333_v61 }
  0x22   :  { %330 = vmatprep.subr.bf16.mxu0 %v329_v55 }
  0x24   :  { %392 = vmatpush1.bf16.msra.mxu1 %v335_v2 }
  0x25   :  { %332 = vmatpush1.bf16.msra.mxu0 %v331_v60  ;;  %377 = vmatprep.subr.bf16.mxu1 %v337_v3 }
  0x26   :  { %334 = vmatprep.subr.bf16.mxu0 %v333_v61 }
  0x28   :  { %393 = vmatpush1.bf16.msra.mxu1 %v339_v8 }
  0x29   :  { %336 = vmatpush1.bf16.msra.mxu0 %v335_v2  ;;  %378 = vmatprep.subr.bf16.mxu1 %v341_v9 }
  0x2a   :  { %338 = vmatprep.subr.bf16.mxu0 %v337_v3 }
  0x2c   :  { %394 = vmatpush1.bf16.msra.mxu1 %v343_v14 }
  0x2d   :  { %340 = vmatpush1.bf16.msra.mxu0 %v339_v8  ;;  %379 = vmatprep.subr.bf16.mxu1 %v345_v15 }
  0x2e   :  { %342 = vmatprep.subr.bf16.mxu0 %v341_v9 }
  0x30   :  { %395 = vmatpush1.bf16.msra.mxu1 %v347_v20 }
  0x31   :  { %344 = vmatpush1.bf16.msra.mxu0 %v343_v14  ;;  %380 = vmatprep.subr.bf16.mxu1 %v349_v21 }
  0x32   :  { %346 = vmatprep.subr.bf16.mxu0 %v345_v15 }
  0x34   :  { %396 = vmatpush1.bf16.msra.mxu1 %v351_v26 }
  0x35   :  { %348 = vmatpush1.bf16.msra.mxu0 %v347_v20  ;;  %381 = vmatprep.subr.bf16.mxu1 %v353_v27 }
  0x36   :  { %350 = vmatprep.subr.bf16.mxu0 %v349_v21 }
  0x38   :  { %397 = vmatpush1.bf16.msra.mxu1 %v355_v32 }
  0x39   :  { %352 = vmatpush1.bf16.msra.mxu0 %v351_v26  ;;  %382 = vmatprep.subr.bf16.mxu1 %v357_v33 }
  0x3a   :  { %354 = vmatprep.subr.bf16.mxu0 %v353_v27 }
  0x3c   :  { %398 = vmatpush1.bf16.msra.mxu1 %v359_v38 }
  0x3d   :  { %356 = vmatpush1.bf16.msra.mxu0 %v355_v32  ;;  %383 = vmatprep.subr.bf16.mxu1 %v361_v39 }
  0x3e   :  { %358 = vmatprep.subr.bf16.mxu0 %v357_v33 }
  0x40   :  { %399 = vmatpush1.bf16.msra.mxu1 %v363_v44 }
  0x41   :  { %360 = vmatpush1.bf16.msra.mxu0 %v359_v38  ;;  %384 = vmatprep.subr.bf16.mxu1 %v365_v45 }
  0x42   :  { %362 = vmatprep.subr.bf16.mxu0 %v361_v39 }
  0x44   :  { %400 = vmatpush1.bf16.msra.mxu1 %v367_v48 }
  0x45   :  { %364 = vmatpush1.bf16.msra.mxu0 %v363_v44 }
  0x46   :  { %366 = vmatprep.subr.bf16.mxu0 %v365_v45 }
  0x49   :  { %368 = vmatpush1.bf16.msra.mxu0 %v367_v48 }
  0xdf   :  { %v105_v49 = vpop.f32.mrb[0].mxu0 }
  0xe0   :  { %v107_v50 = vpop.f32.mrb[1].mxu0 }
  0xe1   :  { %256 = vmatprep.mubr.f32.mxu0 %v107_v50 }
  0xe2   :  { %257 = vmatmul.mubr.f32.vlgmr.msra.gmra.mrb[8].mxu0 %v105_v49 }
  0xe3   :  { %v111_v51 = vpop.f32.mrb[2].mxu0 }
  0xe4   :  { %v113_v52 = vpop.f32.mrb[3].mxu0 }
  0xe5   :  { %262 = vmatprep.mubr.f32.mxu1 %v113_v52 }
  0xe6   :  { %263 = vmatmul.mubr.f32.vlgmr.msra.gmra.mrb[0].mxu1 %v111_v51 }
  0xe7   :  { %v117_v53 = vpop.f32.mrb[4].mxu0 }
  0xe8   :  { %v119_v54 = vpop.f32.mrb[5].mxu0 }
  0xe9   :  { %268 = vmatprep.mubr.f32.mxu1 %v119_v54 }
  0xea   :  { %269 = vmatmul.mubr.f32.gmra.mrb[2].mxu1 %v117_v53 }
  0xeb   :  { %v123_v55 = vpop.f32.mrb[6].mxu0 }
  0xec   :  { %v125_v56 = vpop.f32.mrb[7].mxu0 }
  0xed   :  { %274 = vmatprep.mubr.f32.mxu1 %v125_v56 }
  0xee   :  { %275 = vmatmul.mubr.f32.gmra.mrb[4].mxu1 %v123_v55 }
 0x1b5   :  { %v258_v57 = vpop.f32.mrb[8].mxu0 }
 0x1b6   :  { %281 = vst [vmem:[%s686_s3] sm:$0xff] %v258_v57  ;;  %v260_v58 = vpop.f32.mrb[9].mxu0 }
 0x1b7   :  { %282 = vst [vmem:[%s686_s3 + $0x8] sm:$0xff] %v260_v58 }
 0x1b9   :  { %v264_v59 = vpop.f32.mrb[0].mxu1 }
 0x1ba   :  { %283 = vst [vmem:[%s686_s3 + $0x10] sm:$0xff] %v264_v59  ;;  %v266_v60 = vpop.f32.mrb[1].mxu1 }
 0x1bb   :  { %284 = vst [vmem:[%s686_s3 + $0x18] sm:$0xff] %v266_v60 }
 0x1bd   :  { %v270_v61 = vpop.f32.mrb[2].mxu1 }
 0x1be   :  { %285 = vst [vmem:[%s686_s3 + $0x20] sm:$0xff] %v270_v61  ;;  %v272_v62 = vpop.f32.mrb[3].mxu1 }
 0x1bf   :  { %286 = vst [vmem:[%s686_s3 + $0x28] sm:$0xff] %v272_v62 }
 0x1c1   :  { %v276_v63 = vpop.f32.mrb[4].mxu1 }
 0x1c2   :  { %287 = vst [vmem:[%s686_s3 + $0x30] sm:$0xff] %v276_v63  ;;  %v278_v0 = vpop.f32.mrb[5].mxu1 }
 0x1c3   :  { %288 = vst [vmem:[%s686_s3 + $0x38] sm:$0xff] %v278_v0 }

</bundles_post_ra>
